<compile_context>
chip_gen: v6e
topology: v6e:2x2x1
jax: 0.10.0
libtpu: 0.0.40
codegen_flags: <defaults>
</compile_context>

<pallas_src>
import functools
import math

import jax
import jax.numpy as jnp
from jax.experimental import pallas as pl
from jax.experimental.pallas import tpu as pltpu


# --------------------------- kernel 1: GroupNorm -> fused affine -------------

def _stats_kernel(x_ref, gmat_ref, gamma_ref, beta_ref, aff_ref,
                  sum_scr, sq_scr, *, eps, inv_n):
    si = pl.program_id(1)

    @pl.when(si == 0)
    def _():
        sum_scr[...] = jnp.zeros_like(sum_scr)
        sq_scr[...] = jnp.zeros_like(sq_scr)

    x = x_ref[0]                                            # (blk_s, C_pad) f32
    sum_scr[...] += jnp.sum(x, axis=0, keepdims=True)
    sq_scr[...] += jnp.sum(x * x, axis=0, keepdims=True)

    @pl.when(si == pl.num_programs(1) - 1)
    def _():
        # per-channel sums -> per-group stats broadcast back to channels via
        # the same-group indicator matrix (padded rows of x are zero).
        mean = jnp.dot(sum_scr[...], gmat_ref[...],
                       preferred_element_type=jnp.float32) * inv_n
        ex2 = jnp.dot(sq_scr[...], gmat_ref[...],
                      preferred_element_type=jnp.float32) * inv_n
        var = ex2 - mean * mean          # NOTE: E[x^2]-mean^2; fine for VAE ranges
        rstd = jax.lax.rsqrt(var + eps)
        a = rstd * gamma_ref[...]                           # (1, C_pad)
        b = beta_ref[...] - mean * a                        # (1, C_pad)
        aff_ref[0] = jnp.concatenate([a, b], axis=0)        # (2, C_pad)


# ----------------- kernel 2: norm-apply + K|V projection pre-pass ------------

def _kv_kernel(x_ref, aff_ref, wkv_ref, bkv_ref, kt_ref, v_ref, *, compute_dtype):
    aff = aff_ref[0]                                        # (2, C_pad): [a; b]
    h = x_ref[0] * aff[0:1] + aff[1:2]                      # fused GroupNorm affine
    kv = jnp.dot(h.astype(compute_dtype), wkv_ref[...],
                 preferred_element_type=jnp.float32) + bkv_ref[...]
    c_pad = kt_ref.shape[1]
    # K stored pre-transposed so the attention inner loop has no transpose;
    # the transpose cost here is amortized over all query tiles.
    kt_ref[0] = kv[:, :c_pad].T.astype(compute_dtype)       # (C_pad, blk_kv)
    v_ref[0] = kv[:, c_pad:].astype(compute_dtype)          # (blk_kv, C_pad)


# --------- kernel 3: norm + Q proj + flash attention + proj_out + residual ---

def _attn_kernel(x_ref, aff_ref, wq_ref, wp_ref, bqp_ref, kt_ref, v_ref,
                 o_ref, q_scr, m_scr, l_scr, acc_scr,
                 *, scale, seq_len, need_mask, compute_dtype):
    j = pl.program_id(2)

    # --- new query tile: reset online-softmax state; project (scaled) Q ------
    @pl.when(j == 0)
    def _init():
        m_scr[...] = jnp.full_like(m_scr, -jnp.inf)
        l_scr[...] = jnp.zeros_like(l_scr)
        acc_scr[...] = jnp.zeros_like(acc_scr)
        aff = aff_ref[0]                                    # (2, C_pad): [a; b]
        h = x_ref[0] * aff[0:1] + aff[1:2]                  # fused GroupNorm affine
        q = jnp.dot(h.astype(compute_dtype), wq_ref[...],
                    preferred_element_type=jnp.float32) + bqp_ref[...][0:1]
        q_scr[...] = (q * scale).astype(compute_dtype)      # fold 1/sqrt(C) into Q

    # --- online-softmax update against this K^T / V tile ---------------------
    s = jnp.dot(q_scr[...], kt_ref[0],                      # (blk_q, blk_kv)
                preferred_element_type=jnp.float32)
    if need_mask:                                           # padded KV rows -> -inf
        col = j * s.shape[-1] + jax.lax.broadcasted_iota(jnp.int32, s.shape, 1)
        s = jnp.where(col < seq_len, s, -jnp.inf)

    m_prev = m_scr[...]
    m_new = jnp.maximum(m_prev, jnp.max(s, axis=-1, keepdims=True))
    alpha = jnp.exp(m_prev - m_new)
    p = jnp.exp(s - m_new)                                  # unnormalized probs
    l_scr[...] = alpha * l_scr[...] + jnp.sum(p, axis=-1, keepdims=True)
    acc_scr[...] = alpha * acc_scr[...] + jnp.dot(
        p.astype(compute_dtype), v_ref[0], preferred_element_type=jnp.float32)
    m_scr[...] = m_new

    # --- last KV tile: normalize (exact divide), proj_out, residual ----------
    @pl.when(j == pl.num_programs(2) - 1)
    def _finalize():
        attn = acc_scr[...] / l_scr[...]
        out = jnp.dot(attn.astype(compute_dtype), wp_ref[...],
                      preferred_element_type=jnp.float32) + bqp_ref[...][1:2]
        o_ref[0] = (x_ref[0] + out).astype(o_ref.dtype)


# ----------------------------------- wrapper ---------------------------------

def _round_up(x, m):
    return (x + m - 1) // m * m


def _pick_block(s_pad, target, quantum=128):
    """Largest multiple of `quantum` <= target that divides s_pad (s_pad is a
    multiple of quantum, so the result never drops below `quantum`)."""
    b = max(quantum, min(target, s_pad))
    b -= b % quantum
    while b > quantum and s_pad % b != 0:
        b -= quantum
    return b


def _vmem_limit_bytes(estimate):
    """Derive the scoped-VMEM limit from the tile footprint + device capacity."""
    try:
        cap = int(pltpu.get_tpu_info().vmem_capacity_bytes)
    except Exception:
        cap = 64 * 1024 * 1024        # conservative fallback (v7x physical)
    want = max(int(1.5 * estimate), 32 * 1024 * 1024)
    return int(min(want, int(0.75 * cap)))


def attn_block(x_bsc, params, *, num_groups=32, eps=1e-6,
               block_q=512, block_kv=512, block_stat=1024,
               compute_dtype=jnp.bfloat16):
    """x_bsc: (B, S, C) float32, channels last ("b (h w) c").  Returns (B, S, C)."""
    B, S, C = x_bsc.shape
    assert C % num_groups == 0
    gs = C // num_groups
    C_pad = _round_up(C, 128)
    S_pad = _round_up(S, 128)
    cpad, spad = C_pad - C, S_pad - S

    blk_q = _pick_block(S_pad, block_q)
    blk_kv = _pick_block(S_pad, block_kv)
    blk_s = _pick_block(S_pad, block_stat)
    n_q, n_kv, n_s = S_pad // blk_q, S_pad // blk_kv, S_pad // blk_s

    # ---- padded (lane/sublane-dense) inputs; weights pre-transposed ---------
    x_p = jnp.pad(x_bsc.astype(jnp.float32), ((0, 0), (0, spad), (0, cpad)))

    def pad_mat(w):                       # (C_out, C_in) -> (C_pad_in, C_pad_out)
        return jnp.pad(jnp.asarray(w, jnp.float32).T, ((0, cpad), (0, cpad)))

    def pad_row(v):                       # (1, C) -> (1, C_pad)
        return jnp.pad(jnp.asarray(v, jnp.float32), ((0, 0), (0, cpad)))

    wq_t = pad_mat(params["wq"]).astype(compute_dtype)
    wp_t = pad_mat(params["wp"]).astype(compute_dtype)
    wkv_t = jnp.concatenate([pad_mat(params["wk"]), pad_mat(params["wv"])],
                            axis=1).astype(compute_dtype)      # (C_pad, 2*C_pad)
    bkv_p = jnp.concatenate([pad_row(params["bk"]), pad_row(params["bv"])],
                            axis=1)                            # (1, 2*C_pad)
    bqp_p = jnp.concatenate([pad_row(params["bq"]), pad_row(params["bp"])],
                            axis=0)                            # (2, C_pad)
    gamma_p = pad_row(params["gamma"])    # padded channels get gamma=beta=0 =>
    beta_p = pad_row(params["beta"])      # padded hidden/q/k/v channels are 0.

    # same-group indicator over padded channels (padded channels isolated).
    ch = jnp.arange(C_pad)
    grp = jnp.where(ch < C, ch // gs, num_groups + ch)
    gmat = (grp[:, None] == grp[None, :]).astype(jnp.float32)

    itemsize = jnp.dtype(compute_dtype).itemsize

    # ---- pass 1: GroupNorm statistics -> fused per-batch affine [a; b] ------
    aff = pl.pallas_call(
        functools.partial(_stats_kernel, eps=float(eps),
                          inv_n=1.0 / float(S * gs)),
        out_shape=jax.ShapeDtypeStruct((B, 2, C_pad), jnp.float32),
        grid_spec=pltpu.PrefetchScalarGridSpec(
            num_scalar_prefetch=0,
            grid=(B, n_s),
            in_specs=[pl.BlockSpec((1, blk_s, C_pad), lambda b, s: (b, s, 0)),
                      pl.BlockSpec((C_pad, C_pad), lambda b, s: (0, 0)),
                      pl.BlockSpec((1, C_pad), lambda b, s: (0, 0)),
                      pl.BlockSpec((1, C_pad), lambda b, s: (0, 0))],
            out_specs=pl.BlockSpec((1, 2, C_pad), lambda b, s: (b, 0, 0)),
            scratch_shapes=[pltpu.VMEM((1, C_pad), jnp.float32)] * 2),
        compiler_params=pltpu.CompilerParams(
            dimension_semantics=("parallel", "arbitrary")),
    )(x_p, gmat, gamma_p, beta_p)

    # ---- pass 2: K|V projection pre-pass (K stored transposed, bf16) --------
    k_t, v_p = pl.pallas_call(
        functools.partial(_kv_kernel, compute_dtype=compute_dtype),
        out_shape=(jax.ShapeDtypeStruct((B, C_pad, S_pad), compute_dtype),
                   jax.ShapeDtypeStruct((B, S_pad, C_pad), compute_dtype)),
        grid_spec=pltpu.PrefetchScalarGridSpec(
            num_scalar_prefetch=0,
            grid=(B, n_kv),
            in_specs=[pl.BlockSpec((1, blk_kv, C_pad), lambda b, j: (b, j, 0)),
                      pl.BlockSpec((1, 2, C_pad), lambda b, j: (b, 0, 0)),
                      pl.BlockSpec((C_pad, 2 * C_pad), lambda b, j: (0, 0)),
                      pl.BlockSpec((1, 2 * C_pad), lambda b, j: (0, 0))],
            out_specs=[pl.BlockSpec((1, C_pad, blk_kv), lambda b, j: (b, 0, j)),
                       pl.BlockSpec((1, blk_kv, C_pad), lambda b, j: (b, j, 0))]),
        compiler_params=pltpu.CompilerParams(
            dimension_semantics=("parallel", "parallel")),
    )(x_p, aff, wkv_t, bkv_p)

    # ---- pass 3: Q + flash attention + proj_out + residual ------------------
    est3 = (2 * blk_q * C_pad * 4                 # x q-tile (double buffered)
            + 2 * 2 * C_pad * 4                   # affine
            + 2 * 2 * C_pad * C_pad * itemsize    # Wq^T + Wp^T
            + 2 * 2 * C_pad * 4                   # [bq; bp]
            + 2 * C_pad * blk_kv * itemsize       # K^T tile
            + 2 * blk_kv * C_pad * itemsize       # V tile
            + 2 * blk_q * C_pad * 4               # out tile
            + blk_q * C_pad * (itemsize + 4)      # q_scr + acc
            + 2 * blk_q * 4                       # m, l
            + 2 * blk_q * blk_kv * 4)             # score/prob intermediates
    attn_kernel = functools.partial(
        _attn_kernel, scale=1.0 / math.sqrt(C), seq_len=int(S),
        need_mask=(S_pad != S), compute_dtype=compute_dtype)

    out = pl.pallas_call(
        attn_kernel,
        out_shape=jax.ShapeDtypeStruct((B, S_pad, C_pad), x_bsc.dtype),
        grid_spec=pltpu.PrefetchScalarGridSpec(
            num_scalar_prefetch=0,
            grid=(B, n_q, n_kv),
            in_specs=[
                pl.BlockSpec((1, blk_q, C_pad), lambda b, i, j: (b, i, 0)),   # x (Q rows + residual)
                pl.BlockSpec((1, 2, C_pad), lambda b, i, j: (b, 0, 0)),       # affine [a; b]
                pl.BlockSpec((C_pad, C_pad), lambda b, i, j: (0, 0)),         # Wq^T
                pl.BlockSpec((C_pad, C_pad), lambda b, i, j: (0, 0)),         # Wp^T
                pl.BlockSpec((2, C_pad), lambda b, i, j: (0, 0)),             # [bq; bp]
                pl.BlockSpec((1, C_pad, blk_kv), lambda b, i, j: (b, 0, j)),  # K^T tile
                pl.BlockSpec((1, blk_kv, C_pad), lambda b, i, j: (b, j, 0)),  # V tile
            ],
            out_specs=pl.BlockSpec((1, blk_q, C_pad), lambda b, i, j: (b, i, 0)),
            scratch_shapes=[
                pltpu.VMEM((blk_q, C_pad), compute_dtype),   # Q tile (scaled)
                pltpu.VMEM((blk_q, 1), jnp.float32),         # running max
                pltpu.VMEM((blk_q, 1), jnp.float32),         # running sum
                pltpu.VMEM((blk_q, C_pad), jnp.float32),     # output accumulator
            ]),
        # KV is streamed from HBM, so the query axis carries no cross-tile
        # state and can be megacore-parallel (uses both v7x TCs at B=1).
        compiler_params=pltpu.CompilerParams(
            dimension_semantics=("parallel", "parallel", "arbitrary"),
            vmem_limit_bytes=_vmem_limit_bytes(est3)),
    )(x_p, aff, wq_t, wp_t, bqp_p, k_t, v_p)

    return out[:, :S, :C]


def _reference(x_bsc, params, *, num_groups=32, eps=1e-6):
    """Pure-JAX reference mirroring the PyTorch AttnBlock forward."""
    B, S, C = x_bsc.shape
    gs = C // num_groups
    xg = x_bsc.reshape(B, S, num_groups, gs)
    mean = xg.mean(axis=(1, 3), keepdims=True)
    var = ((xg - mean) ** 2).mean(axis=(1, 3), keepdims=True)
    hidden = ((xg - mean) / jnp.sqrt(var + eps)).reshape(B, S, C)
    hidden = hidden * params["gamma"] + params["beta"]

    q = hidden @ params["wq"].T + params["bq"]
    k = hidden @ params["wk"].T + params["bk"]
    v = hidden @ params["wv"].T + params["bv"]
    logits = jnp.einsum("bqc,bkc->bqk", q, k) / jnp.sqrt(jnp.float32(C))
    p = jax.nn.softmax(logits, axis=-1)
    attn = jnp.einsum("bqk,bkc->bqc", p, v)
    out = attn @ params["wp"].T + params["bp"]
    return x_bsc + out


if __name__ == "__main__":
    key = jax.random.PRNGKey(0)

    def make_params(k, C):
        ks = jax.random.split(k, 10)
        return {
            "gamma": (1.0 + 0.1 * jax.random.normal(ks[0], (1, C))).astype(jnp.float32),
            "beta": (0.1 * jax.random.normal(ks[1], (1, C))).astype(jnp.float32),
            "wq": (0.1 * jax.random.normal(ks[2], (C, C))).astype(jnp.float32),
            "bq": (0.05 * jax.random.normal(ks[3], (1, C))).astype(jnp.float32),
            "wk": (0.1 * jax.random.normal(ks[4], (C, C))).astype(jnp.float32),
            "bk": (0.05 * jax.random.normal(ks[5], (1, C))).astype(jnp.float32),
            "wv": (0.1 * jax.random.normal(ks[6], (C, C))).astype(jnp.float32),
            "bv": (0.05 * jax.random.normal(ks[7], (1, C))).astype(jnp.float32),
            "wp": (0.1 * jax.random.normal(ks[8], (C, C))).astype(jnp.float32),
            "bp": (0.05 * jax.random.normal(ks[9], (1, C))).astype(jnp.float32),
        }

    # --- Case 1: PyTorch NCHW input, S = 64 < 128 -> exercises the sequence
    #     padding + KV score masking path.
    B, C, H, W = 2, 32, 8, 8            # num_groups=32 requires C % 32 == 0
    S = H * W
    kx, kp, key = jax.random.split(key, 3)
    x_nchw = jax.random.normal(kx, (B, C, H, W), dtype=jnp.float32)
    params = make_params(kp, C)

    # NCHW -> (B, S, C)   ("b c h w -> b (h w) c")
    x_bsc = jnp.transpose(x_nchw, (0, 2, 3, 1)).reshape(B, S, C)
    ref = _reference(x_bsc, params)

    out_bf16 = jax.block_until_ready(attn_block(x_bsc, params,
                                                compute_dtype=jnp.bfloat16))
    err_bf16 = float(jnp.max(jnp.abs(out_bf16 - ref)))
    assert err_bf16 < 5e-2, err_bf16

    out_f32 = jax.block_until_ready(attn_block(x_bsc, params,
                                               compute_dtype=jnp.float32))
    err_f32 = float(jnp.max(jnp.abs(out_f32 - ref)))
    assert err_f32 < 2e-2, err_f32

    # back to NCHW (the module's output layout)
    out_nchw = jnp.transpose(out_bf16.reshape(B, H, W, C), (0, 3, 1, 2))
    assert out_nchw.shape == (B, C, H, W)

    # --- Case 2: S = 256 with 128-wide tiles -> 2 query tiles x 2 KV tiles,
    #     exercising online-softmax accumulation, the KV pre-pass over multiple
    #     tiles and the megacore-parallel query axis.
    B2, C2, H2, W2 = 1, 64, 16, 16
    kx2, kp2, key = jax.random.split(key, 3)
    x2 = jax.random.normal(kx2, (B2, H2 * W2, C2), dtype=jnp.float32)
    params2 = make_params(kp2, C2)
    ref2 = _reference(x2, params2)
    out2 = jax.block_until_ready(
        attn_block(x2, params2, block_q=128, block_kv=128, block_stat=128,
                   compute_dtype=jnp.bfloat16))
    err2 = float(jnp.max(jnp.abs(out2 - ref2)))
    assert err2 < 5e-2, err2

    print("KERNEL_OK")
</pallas_src>

<mosaic_0001>
module attributes {stable_mosaic.version = 11 : i64} {
  func.func @_stats_kernel(%arg0: i32, %arg1: i32, %arg2: memref<1x128x128xf32, #tpu.memory_space<vmem>>, %arg3: memref<128x128xf32, #tpu.memory_space<vmem>>, %arg4: memref<1x128xf32, #tpu.memory_space<vmem>>, %arg5: memref<1x128xf32, #tpu.memory_space<vmem>>, %arg6: memref<1x2x128xf32, #tpu.memory_space<vmem>>, %arg7: memref<1x128xf32, #tpu.memory_space<vmem>>, %arg8: memref<1x128xf32, #tpu.memory_space<vmem>>) attributes {dimension_semantics = [#tpu.dimension_semantics<parallel>, #tpu.dimension_semantics<arbitrary>], iteration_bounds = array<i64: 2, 1>, scalar_prefetch = 0 : i64, scratch_operands = 2 : i64, tpu.core_type = #tpu.core_type<tc>, window_params = [{transform_indices = @transform_0, window_bounds = array<i64: 1, 128, 128>}, {pipeline_mode = #tpu.pipeline_mode<synchronous>, transform_indices = @transform_1, window_bounds = array<i64: 128, 128>}, {pipeline_mode = #tpu.pipeline_mode<synchronous>, transform_indices = @transform_2, window_bounds = array<i64: 1, 128>}, {pipeline_mode = #tpu.pipeline_mode<synchronous>, transform_indices = @transform_3, window_bounds = array<i64: 1, 128>}, {transform_indices = @transform_4, window_bounds = array<i64: 1, 2, 128>}]} {
    %c0_i32 = arith.constant 0 : i32
    %0 = arith.cmpi eq, %arg1, %c0_i32 : i32
    %1 = arith.extui %0 : i1 to i32
    %c0_i32_0 = arith.constant 0 : i32
    %2 = arith.cmpi ne, %1, %c0_i32_0 : i32
    scf.if %2 {
      %cst_14 = arith.constant 0.000000e+00 : f32
      %19 = vector.broadcast %cst_14 : f32 to vector<1x128xf32>
      %c0_15 = arith.constant 0 : index
      %c0_16 = arith.constant 0 : index
      %20 = vector.load %arg7[%c0_15, %c0_16] : memref<1x128xf32, #tpu.memory_space<vmem>>, vector<1x128xf32>
      tpu.vector_store %arg7[%c0_15, %c0_16], %19 {strides = array<i32>} : memref<1x128xf32, #tpu.memory_space<vmem>>, vector<1x128xf32>,
      %cst_17 = arith.constant 0.000000e+00 : f32
      %21 = vector.broadcast %cst_17 : f32 to vector<1x128xf32>
      %c0_18 = arith.constant 0 : index
      %c0_19 = arith.constant 0 : index
      %22 = vector.load %arg8[%c0_18, %c0_19] : memref<1x128xf32, #tpu.memory_space<vmem>>, vector<1x128xf32>
      tpu.vector_store %arg8[%c0_18, %c0_19], %21 {strides = array<i32>} : memref<1x128xf32, #tpu.memory_space<vmem>>, vector<1x128xf32>,
    } else {
    }
    %c0 = arith.constant 0 : index
    %c0_1 = arith.constant 0 : index
    %c0_2 = arith.constant 0 : index
    %3 = vector.load %arg2[%c0, %c0_1, %c0_2] : memref<1x128x128xf32, #tpu.memory_space<vmem>>, vector<1x128x128xf32>
    %4 = vector.shape_cast %3 : vector<1x128x128xf32> to vector<128x128xf32>
    %c0_3 = arith.constant 0 : index
    %c0_4 = arith.constant 0 : index
    %5 = vector.load %arg7[%c0_3, %c0_4] : memref<1x128xf32, #tpu.memory_space<vmem>>, vector<1x128xf32>
    %cst = arith.constant dense<0.000000e+00> : vector<128xf32>
    %6 = vector.multi_reduction <add>, %4, %cst [0] : vector<128x128xf32> to vector<128xf32>
    %7 = vector.shape_cast %6 : vector<128xf32> to vector<1x128xf32>
    %8 = arith.addf %5, %7 : vector<1x128xf32>
    %c0_5 = arith.constant 0 : index
    %c0_6 = arith.constant 0 : index
    %9 = vector.load %arg7[%c0_5, %c0_6] : memref<1x128xf32, #tpu.memory_space<vmem>>, vector<1x128xf32>
    tpu.vector_store %arg7[%c0_5, %c0_6], %8 {strides = array<i32>} : memref<1x128xf32, #tpu.memory_space<vmem>>, vector<1x128xf32>,
    %c0_7 = arith.constant 0 : index
    %c0_8 = arith.constant 0 : index
    %10 = vector.load %arg8[%c0_7, %c0_8] : memref<1x128xf32, #tpu.memory_space<vmem>>, vector<1x128xf32>
    %11 = arith.mulf %4, %4 : vector<128x128xf32>
    %cst_9 = arith.constant dense<0.000000e+00> : vector<128xf32>
    %12 = vector.multi_reduction <add>, %11, %cst_9 [0] : vector<128x128xf32> to vector<128xf32>
    %13 = vector.shape_cast %12 : vector<128xf32> to vector<1x128xf32>
    %14 = arith.addf %10, %13 : vector<1x128xf32>
    %c0_10 = arith.constant 0 : index
    %c0_11 = arith.constant 0 : index
    %15 = vector.load %arg8[%c0_10, %c0_11] : memref<1x128xf32, #tpu.memory_space<vmem>>, vector<1x128xf32>
    tpu.vector_store %arg8[%c0_10, %c0_11], %14 {strides = array<i32>} : memref<1x128xf32, #tpu.memory_space<vmem>>, vector<1x128xf32>,
    %c0_i32_12 = arith.constant 0 : i32
    %16 = arith.cmpi eq, %arg1, %c0_i32_12 : i32
    %17 = arith.extui %16 : i1 to i32
    %c0_i32_13 = arith.constant 0 : i32
    %18 = arith.cmpi ne, %17, %c0_i32_13 : i32
    scf.if %18 {
      %c0_14 = arith.constant 0 : index
      %c0_15 = arith.constant 0 : index
      %19 = vector.load %arg7[%c0_14, %c0_15] : memref<1x128xf32, #tpu.memory_space<vmem>>, vector<1x128xf32>
      %c0_16 = arith.constant 0 : index
      %c0_17 = arith.constant 0 : index
      %20 = vector.load %arg3[%c0_16, %c0_17] : memref<128x128xf32, #tpu.memory_space<vmem>>, vector<128x128xf32>
      %cst_18 = arith.constant dense<0.000000e+00> : vector<1x128xf32>
      %21 = tpu.matmul %19, %20, %cst_18 {dimension_numbers = #tpu.dot_dimension_numbers<[1], [0], [0], [1], [0, 0, 1, 1], [], []>} : vector<1x128xf32>, vector<128x128xf32>, vector<1x128xf32> -> vector<1x128xf32>
      %cst_19 = arith.constant 1.562500e-02 : f32
      %22 = vector.broadcast %cst_19 : f32 to vector<1x128xf32>
      %23 = arith.mulf %21, %22 : vector<1x128xf32>
      %c0_20 = arith.constant 0 : index
      %c0_21 = arith.constant 0 : index
      %24 = vector.load %arg8[%c0_20, %c0_21] : memref<1x128xf32, #tpu.memory_space<vmem>>, vector<1x128xf32>
      %c0_22 = arith.constant 0 : index
      %c0_23 = arith.constant 0 : index
      %25 = vector.load %arg3[%c0_22, %c0_23] : memref<128x128xf32, #tpu.memory_space<vmem>>, vector<128x128xf32>
      %cst_24 = arith.constant dense<0.000000e+00> : vector<1x128xf32>
      %26 = tpu.matmul %24, %25, %cst_24 {dimension_numbers = #tpu.dot_dimension_numbers<[1], [0], [0], [1], [0, 0, 1, 1], [], []>} : vector<1x128xf32>, vector<128x128xf32>, vector<1x128xf32> -> vector<1x128xf32>
      %cst_25 = arith.constant 1.562500e-02 : f32
      %27 = vector.broadcast %cst_25 : f32 to vector<1x128xf32>
      %28 = arith.mulf %26, %27 : vector<1x128xf32>
      %29 = arith.mulf %23, %23 : vector<1x128xf32>
      %30 = arith.subf %28, %29 : vector<1x128xf32>
      %cst_26 = arith.constant 9.99999997E-7 : f32
      %31 = vector.broadcast %cst_26 : f32 to vector<1x128xf32>
      %32 = arith.addf %30, %31 : vector<1x128xf32>
      %33 = math.rsqrt %32 : vector<1x128xf32>
      %c0_27 = arith.constant 0 : index
      %c0_28 = arith.constant 0 : index
      %34 = vector.load %arg4[%c0_27, %c0_28] : memref<1x128xf32, #tpu.memory_space<vmem>>, vector<1x128xf32>
      %35 = arith.mulf %33, %34 : vector<1x128xf32>
      %c0_29 = arith.constant 0 : index
      %c0_30 = arith.constant 0 : index
      %36 = vector.load %arg5[%c0_29, %c0_30] : memref<1x128xf32, #tpu.memory_space<vmem>>, vector<1x128xf32>
      %37 = arith.mulf %23, %35 : vector<1x128xf32>
      %38 = arith.subf %36, %37 : vector<1x128xf32>
      %39 = tpu.concatenate %35, %38 in 0 : vector<1x128xf32>, vector<1x128xf32> -> vector<2x128xf32>
      %c0_31 = arith.constant 0 : index
      %c0_32 = arith.constant 0 : index
      %c0_33 = arith.constant 0 : index
      %40 = vector.load %arg6[%c0_31, %c0_32, %c0_33] : memref<1x2x128xf32, #tpu.memory_space<vmem>>, vector<1x2x128xf32>
      %41 = vector.shape_cast %40 : vector<1x2x128xf32> to vector<2x128xf32>
      %42 = vector.shape_cast %39 : vector<2x128xf32> to vector<1x2x128xf32>
      tpu.vector_store %arg6[%c0_31, %c0_32, %c0_33], %42 {strides = array<i32>} : memref<1x2x128xf32, #tpu.memory_space<vmem>>, vector<1x2x128xf32>,
    } else {
    }
    return
  }
  func.func @transform_0(%arg0: i32, %arg1: i32) -> (i32, i32, i32) {
    %c0_i32 = arith.constant 0 : i32
    %c0_i32_0 = arith.constant 0 : i32
    return %arg0, %arg1, %c0_i32 : i32, i32, i32
  }
  func.func @transform_1(%arg0: i32, %arg1: i32) -> (i32, i32) {
    %c0_i32 = arith.constant 0 : i32
    %c0_i32_0 = arith.constant 0 : i32
    %c0_i32_1 = arith.constant 0 : i32
    return %c0_i32, %c0_i32_0 : i32, i32
  }
  func.func @transform_2(%arg0: i32, %arg1: i32) -> (i32, i32) {
    %c0_i32 = arith.constant 0 : i32
    %c0_i32_0 = arith.constant 0 : i32
    %c0_i32_1 = arith.constant 0 : i32
    return %c0_i32, %c0_i32_0 : i32, i32
  }
  func.func @transform_3(%arg0: i32, %arg1: i32) -> (i32, i32) {
    %c0_i32 = arith.constant 0 : i32
    %c0_i32_0 = arith.constant 0 : i32
    %c0_i32_1 = arith.constant 0 : i32
    return %c0_i32, %c0_i32_0 : i32, i32
  }
  func.func @transform_4(%arg0: i32, %arg1: i32) -> (i32, i32, i32) {
    %c0_i32 = arith.constant 0 : i32
    %c0_i32_0 = arith.constant 0 : i32
    %c0_i32_1 = arith.constant 0 : i32
    return %arg0, %c0_i32, %c0_i32_0 : i32, i32, i32
  }
}

</mosaic_0001>

<bundles_post_ra>
// kernel: tpu_custom_call.1
= control target key start
LH: loop header
LB: loop body
LE: loop exit
PB: predicated region body
PF: predicated region fallthrough
CT: control target
= control target key end

     0   :  { %s1232_s0 = inlined_call_operand.hbm [shape: f32[2,128,128], index: 0, kind: input, shape index: {}]   ;;  %s1233_s1 = inlined_call_operand.hbm [shape: f32[128,128], index: 1, kind: input, shape index: {}]   ;;  %s1234_s2 = inlined_call_operand.vmem [shape: f32[1,128], index: 2, kind: input, shape index: {}]   ;;  %s1235_s3 = inlined_call_operand.vmem [shape: f32[1,128], index: 3, kind: input, shape index: {}]   ;;  %s1236_s4 = inlined_call_operand.hbm [shape: f32[2,2,128], index: 4, kind: output, shape index: {}]  }
   0x1   :  { %1240 = sst [smem:[#allocation13_spill]] %s1233_s1 }
   0x2   :  { %9 = vsyncpa [#allocation5], 0 }
   0x3   :  { %11 = vsyncpa [#allocation5 + $0x1], 0 }
   0x4   :  { %12 = vsyncpa [#allocation8], 0 }
   0x5   :  { %13 = vsyncpa [#allocation6], 0 }
   0x6   :  { %15 = vsyncpa [#allocation6 + $0x1], 0  ;;  %s992_s15 = smov 0   ;;  %s994_s16 = smov 0  }
   0x7   :  { %s996_s17 = smov 0   ;;  %s998_s18 = smov 0  }
   0x8   :  { %s1000_s19 = smov 0   ;;  %s1002_s20 = smov 0  }
   0x9 LB: > { %s620_s21 = sadd.s32 4294967295, %s958_s20   ;;  %s621_s22 = sadd.s32 4294967294, %s958_s20   ;;  %s958_s20 = sphi %s1002_s20, %s21_s20   ;;  %s954_s19 = sphi %s1000_s19, %s1260_s19   ;;  %s950_s18 = sphi %s998_s18, %s1259_s18   ;;  %s946_s17 = sphi %s996_s17, %s1258_s17   ;;  %s942_s16 = sphi %s994_s16, %s1257_s16   ;;  %s938_s15 = sphi %s992_s15, %s1256_s15  }
   0xa   : > { %p55_p0 = scmp.ne.s32.totalorder %s942_s16, %s938_s15  ;;  %p1026_p1 = scmp.eq.s32.totalorder %s620_s21, 0 }
   0xb   : > { %p1030_p2 = scmp.eq.s32.totalorder %s620_s21, 1  ;;  %p148_p3 = scmp.eq.s32.totalorder %s621_s22, 1 }
   0xc   : > { %p1036_p4 = por %p1026_p1, %p55_p0  ;;  %p622_p5 = scmp.ge.s32.totalorder %s958_s20, 1 }
   0xd   : > { %p1041_p6 = por %p148_p3, %p55_p0  ;;  %p155_p7 = scmp.lt.s32.totalorder %s958_s20, 3 }
   0xe   : > { %s1243_s25 = scalar_select %p1036_p4, 1, 0 }
   0xf   : > { %s1244_s26 = scalar_select %p1041_p6, 1, 0 }
  0x10   : > { %p1046_p8 = pnand %p622_p5, %p155_p7  ;;  %s960_s28 = smov [#allocation7]  }
  0x11   : > { %s167_s29 = sshll.u32 %s960_s28, 4  ;;  %s33_s5 = sadd.s32 1, %s954_s19  ;;  %s168_s29 = int_to_ptr.vmem [resolvable:$true] %s167_s29 }
  0x12   : > { %p749_p9 = pneg %p1046_p8  ;;  %s831_s6 = scalar_lea.vmem %s168_s29, 2048 }
  0x13   : > { %p832_p13 = scmp.ne.s32.totalorder %s168_s29, %s831_s6  ;;  %p839_p5 = scmp.lt.s32.totalorder %s168_s29, %s168_s29 }
  0x14   : > { %p1055_p11 = pnand %p749_p9, %p1026_p1  ;;  %p840_p7 = scmp.lt.s32.totalorder %s831_s6, %s831_s6 }
  0x16   : > { %p822_p12 = pneg %p1055_p11  ;;  %p841_p6 = por %p840_p7, %p839_p5 }
  0x18   : > { %p834_p0 = pnand %p832_p13, %p822_p12 }
  0x1a   : > { %p835_p3 = pneg %p834_p0 }
  0x1c   : > { %p842_p4 = pnand %p841_p6, %p835_p3 }
  0x1e   : > { %845 = shalt.err (!%p842_p4)
}
  0x1f   : > { %s1238_s7 = smov 128   ;;  %s1239_s8 = smov 8  }
  0x20   : > { %s1247_s1 = sld [smem:[#allocation13_spill]]  ;;  %p35_p4 = scmp.ge.s32.totalorder %s33_s5, 2 }
  0x21   : > { %s42_s11 = sadd.s32 1, %s946_s17  ;;  %p49_p6 = scmp.ne.s32.totalorder %s946_s17, %s942_s16 }
  0x22   : > { %p50_p9 = scmp.eq.s32.totalorder %s958_s20, 0  ;;  %s1262_s5 = smov (%p35_p4, %s33_s5), 0 }
  0x23   : > { %p1082_p13 = por %p1030_p2, %p49_p6  ;;  %s37_s14 = ssub.s32 %s954_s19, %s1262_s5 }
  0x24   : > { %p1076_p12 = por %p50_p9, %p49_p6  ;;  %p762_p0 = scmp.lt.s32.totalorder %s958_s20, 2 }
  0x25   : > { %s187_s21 = sand.u32 1, %s946_s17  }
  0x26   : > { %752 = dma.hbm_to_vmem [thread:$0]  (!%p1055_p11), %s1247_s1, 2048, %s168_s29, [#allocation8], %s1238_s7, %s1238_s7, %s1239_s8  }
  0x27   : > { %p40_p11 = scmp.eq.s32.totalorder %s37_s14, 0  ;;  %s625_s22 = sshll.u32 %s187_s21, 7 }
  0x28   : > { %s636_s29 = sshll.u32 %s954_s19, 11  ;;  %s191_s10 = scalar_lea.vmem [#allocation4], %s625_s22 }
  0x29   : > { %s1091_s28 = scalar_select %p40_p11, %s946_s17, %s42_s11  }
  0x2a   : > { %s199_s9 = scalar_lea.hbm %s1232_s0, %s636_s29  ;;  %s200_s7 = sshll.u32 %s191_s10, 4  ;;  %s201_s7 = int_to_ptr.vmem [resolvable:$true] %s200_s7 }
  0x2b   : > { %p1099_p2 = pnand %p762_p0, %p1076_p12  ;;  %s188_s8 = scalar_lea.sflag [#allocation5], %s187_s21 }
  0x2c   : > { %s859_s14 = scalar_lea.vmem %s201_s7, 2048  ;;  %s963_s11 = smov [#allocation4]  }
  0x2d   : > { %p848_p3 = pneg %p1099_p2  ;;  %p860_p5 = scmp.ne.s32.totalorder %s201_s7, %s859_s14 }
  0x2e   : > { %s864_s1 = sshll.u32 %s963_s11, 4  ;;  %s865_s1 = int_to_ptr.vmem [resolvable:$false] %s864_s1 }
  0x2f   : > { %p862_p7 = pnand %p860_p5, %p848_p3  ;;  %s866_s29 = scalar_lea.vmem %s865_s1, 4096 }
  0x30   : > { %p867_p6 = scmp.lt.s32.totalorder %s201_s7, %s865_s1  ;;  %p868_p9 = scmp.lt.s32.totalorder %s866_s29, %s859_s14 }
  0x31   : > { %p863_p4 = pneg %p862_p7 }
  0x32   : > { %p869_p11 = por %p868_p9, %p867_p6 }
  0x34   : > { %p870_p10 = pnand %p869_p11, %p863_p4 }
  0x36   : > { %873 = shalt.err (!%p870_p10)
}
  0x37   : > { %s1251_s12 = smov 8   ;;  %s1252_s22 = smov 128  }
  0x38   : > { %756 = dma.hbm_to_vmem [thread:$0]  (!%p1099_p2), %s199_s9, 2048, %s201_s7, %s188_s8, %s1252_s22, %s1252_s22, %s1251_s12  }
  0x39   : > { %212 = sbr.rel (%p1046_p8) target bundleno = 357 (0x165), region = 36  ;;  %s1113_s21 = sand.u32 (!%p1046_p8), 1, %s942_s16  }
  0x3a   : > { %s629_s1 = sshll.u32 (!%p1046_p8), %s1113_s21, 7  ;;  %s215_s30 = scalar_lea.sflag (!%p1046_p8), [#allocation5], %s1113_s21 }
  0x3b   : > { %s1117_s6 = scalar_lea.vmem (!%p1046_p8), [#allocation4], %s629_s1  ;;  %p1253_p10 = scmp.ne.s32.totalorder (!%p1046_p8), %s1243_s25, 0 }
  0x3e   : > { %925 = dma.done.wait (%p1253_p10), %s215_s30, 2048  }
  0x3f   : > { %927 = vsyncadd (%p1253_p10), %s215_s30, 4294965248 }
  0x40   : > { %929 = dma.done.wait (%p1026_p1), [#allocation8], 2048  }
  0x41   : > { %931 = vsyncadd (%p1026_p1), [#allocation8], 4294965248  ;;  %v964_v0 = vmov 0.0   ;;  %vm965_vm0 = vmmov 0   ;;  %v353_v1 = vld [vmem:[#allocation7 + $0x78] sm:$0xff]  ;;  %v352_v2 = vld [vmem:[#allocation7 + $0x70] sm:$0xff] }
  0x42   : > { %671 = vmatprep.subr.mxu0 %v964_v0  ;;  %252 = vst [vmem:[#allocation2] sm:$0x1] %v964_v0  ;;  %253 = vst [vmem:[#allocation3] sm:$0x1] %v964_v0  ;;  %706 = vmatprep.subr.mxu1 %v964_v0  ;;  %v351_v3 = vld [vmem:[#allocation7 + $0x68] sm:$0xff]  ;;  %v350_v4 = vld [vmem:[#allocation7 + $0x60] sm:$0xff] }
  0x43   : > { %703 = vmatprep.mubr.msk.f32.mxu0 %vm965_vm0, %v964_v0  ;;  %738 = vmatprep.mubr.msk.f32.mxu1 %vm965_vm0, %v964_v0  ;;  %v254_v5 = vld [vmem:[%s1117_s6] sm:$0xff]  ;;  %v255_v6 = vld [vmem:[%s1117_s6 + $0x8] sm:$0xff]  ;;  %v349_v7 = vld [vmem:[#allocation7 + $0x58] sm:$0xff]  ;;  %s631_s27 = sshll.u32 %s1113_s21, 1  ;;  %s633_s9 = sshll.u32 %s950_s18, 5  ;;  %vm512_vm1 = vcmask 1040384  }
  0x44   : > { %672 = vmatpush3.msra.mxu0 %v353_v1  ;;  %707 = vmatpush3.msra.mxu1 %v353_v1  ;;  %v256_v8 = vld [vmem:[%s1117_s6 + $0x10] sm:$0xff]  ;;  %v271_v9 = vadd.f32 %v255_v6, %v254_v5  ;;  %v257_v10 = vld [vmem:[%s1117_s6 + $0x18] sm:$0xff]  ;;  %v295_v13 = vmul.f32 %v254_v5, %v254_v5  ;;  %v296_v14 = vmul.f32 %v255_v6, %v255_v6  ;;  %v258_v15 = vld [vmem:[%s1117_s6 + $0x20] sm:$0xff]  ;;  %s246_s10 = scalar_lea.vmem [#allocation9], %s631_s27  ;;  %s1190_s29 = scalar_lea.hbm %s1236_s4, %s633_s9 }
  0x45   : > { %673 = vmatprep.subr.mxu0 %v964_v0  ;;  %708 = vmatprep.subr.mxu1 %v964_v0  ;;  %v348_v11 = vld [vmem:[#allocation7 + $0x50] sm:$0xff]  ;;  %v347_v16 = vld [vmem:[#allocation7 + $0x48] sm:$0xff]  ;;  %v297_v18 = vmul.f32 %v256_v8, %v256_v8  ;;  %v346_v20 = vld [vmem:[#allocation7 + $0x40] sm:$0xff]  ;;  %v298_v22 = vmul.f32 %v257_v10, %v257_v10  ;;  %v299_v27 = vmul.f32 %v258_v15, %v258_v15  ;;  %s529_s24 = sshll.u32 %s246_s10, 4  ;;  %s516_s12 = scalar_lea.sflag [#allocation6], %s1113_s21  ;;  %s530_s24 = int_to_ptr.vmem [resolvable:$true] %s529_s24 }
  0x46   : > { %674 = vmatpush3.msra.mxu0 %v352_v2  ;;  %709 = vmatpush3.msra.mxu1 %v352_v2  ;;  %v272_v12 = vadd.f32 %v271_v9, %v256_v8  ;;  %v259_v19 = vld [vmem:[%s1117_s6 + $0x28] sm:$0xff]  ;;  %v311_v23 = vadd.f32 %v296_v14, %v295_v13  ;;  %v260_v24 = vld [vmem:[%s1117_s6 + $0x30] sm:$0xff]  ;;  %v345_v25 = vld [vmem:[#allocation7 + $0x38] sm:$0xff]  ;;  %s874_s22 = scalar_lea.vmem %s530_s24, 32  ;;  %s966_s1 = smov [#allocation9]  }
  0x47   : > { %675 = vmatprep.subr.mxu0 %v964_v0  ;;  %710 = vmatprep.subr.mxu1 %v964_v0  ;;  %v261_v29 = vld [vmem:[%s1117_s6 + $0x38] sm:$0xff]  ;;  %v344_v30 = vld [vmem:[#allocation7 + $0x30] sm:$0xff]  ;;  %v300_v32 = vmul.f32 %v259_v19, %v259_v19  ;;  %v262_v34 = vld [vmem:[%s1117_s6 + $0x40] sm:$0xff]  ;;  %v301_v37 = vmul.f32 %v260_v24, %v260_v24  ;;  %p875_p1 = scmp.ne.s32.totalorder %s530_s24, %s874_s22  ;;  %s878_s18 = sshll.u32 %s966_s1, 4  ;;  %s879_s18 = int_to_ptr.vmem [resolvable:$false] %s878_s18 }
  0x48   : > { %676 = vmatpush3.msra.mxu0 %v351_v3  ;;  %711 = vmatpush3.msra.mxu1 %v351_v3  ;;  %v273_v17 = vadd.f32 %v272_v12, %v257_v10  ;;  %v312_v28 = vadd.f32 %v311_v23, %v297_v18  ;;  %v343_v35 = vld [vmem:[#allocation7 + $0x28] sm:$0xff]  ;;  %v342_v40 = vld [vmem:[#allocation7 + $0x20] sm:$0xff]  ;;  %v302_v42 = vmul.f32 %v261_v29, %v261_v29  ;;  %v264_v44 = vld [vmem:[%s1117_s6 + $0x50] sm:$0xff]  ;;  %s880_s30 = scalar_lea.vmem %s879_s18, 64  ;;  %p881_p0 = scmp.lt.s32.totalorder %s530_s24, %s879_s18 }
  0x49   : > { %677 = vmatprep.subr.mxu0 %v964_v0  ;;  %712 = vmatprep.subr.mxu1 %v964_v0  ;;  %v263_v39 = vld [vmem:[%s1117_s6 + $0x48] sm:$0xff]  ;;  %v341_v45 = vld [vmem:[#allocation7 + $0x18] sm:$0xff]  ;;  %v303_v47 = vmul.f32 %v262_v34, %v262_v34  ;;  %v340_v50 = vld [vmem:[#allocation7 + $0x10] sm:$0xff]  ;;  %v305_v57 = vmul.f32 %v264_v44, %v264_v44  ;;  %p876_p8 = pnand %p875_p1, %p1082_p13  ;;  %p882_p2 = scmp.lt.s32.totalorder %s880_s30, %s874_s22 }
  0x4a   : > { %678 = vmatpush3.msra.mxu0 %v350_v4  ;;  %713 = vmatpush3.msra.mxu1 %v350_v4  ;;  %v274_v21 = vadd.f32 %v273_v17, %v258_v15  ;;  %v313_v33 = vadd.f32 %v312_v28, %v298_v22  ;;  %v265_v49 = vld [vmem:[%s1117_s6 + $0x58] sm:$0xff]  ;;  %v304_v52 = vmul.f32 %v263_v39, %v263_v39  ;;  %v266_v54 = vld [vmem:[%s1117_s6 + $0x60] sm:$0xff]  ;;  %v339_v55 = vld [vmem:[#allocation7 + $0x8] sm:$0xff] }
  0x4b   : > { %679 = vmatprep.subr.mxu0 %v964_v0  ;;  %714 = vmatprep.subr.mxu1 %v964_v0  ;;  %v267_v59 = vld [vmem:[%s1117_s6 + $0x68] sm:$0xff]  ;;  %v338_v60 = vld [vmem:[#allocation7] sm:$0xff]  ;;  %v306_v62 = vmul.f32 %v265_v49, %v265_v49  ;;  %v268_v1 = vld [vmem:[%s1117_s6 + $0x70] sm:$0xff]  ;;  %v307_v3 = vmul.f32 %v266_v54, %v266_v54  ;;  %p877_p12 = pneg %p876_p8  ;;  %p883_p3 = por %p882_p2, %p881_p0 }
  0x4c   : > { %680 = vmatpush3.msra.mxu0 %v349_v7  ;;  %715 = vmatpush3.msra.mxu1 %v349_v7  ;;  %v275_v26 = vadd.f32 %v274_v21, %v259_v19  ;;  %v314_v38 = vadd.f32 %v313_v33, %v299_v27  ;;  %v269_v5 = vld [vmem:[%s1117_s6 + $0x78] sm:$0xff]  ;;  %v308_v7 = vmul.f32 %v267_v59, %v267_v59 }
  0x4d   : > { %681 = vmatprep.subr.mxu0 %v964_v0  ;;  %716 = vmatprep.subr.mxu1 %v964_v0  ;;  %v309_v10 = vmul.f32 %v268_v1, %v268_v1  ;;  %v310_v13 = vmul.f32 %v269_v5, %v269_v5  ;;  %v270_v22 = vld [vmem:[#allocation2] sm:$0x1]  ;;  %v294_v28 = vld [vmem:[#allocation3] sm:$0x1]  ;;  %p884_p5 = pnand %p883_p3, %p877_p12 }
  0x4e   : > { %682 = vmatpush3.msra.mxu0 %v348_v11  ;;  %717 = vmatpush3.msra.mxu1 %v348_v11  ;;  %v276_v31 = vadd.f32 %v275_v26, %v260_v24  ;;  %v315_v43 = vadd.f32 %v314_v38, %v300_v32 }
  0x4f   : > { %683 = vmatprep.subr.mxu0 %v964_v0  ;;  %718 = vmatprep.subr.mxu1 %v964_v0 }
  0x50   : > { %684 = vmatpush3.msra.mxu0 %v347_v16  ;;  %719 = vmatpush3.msra.mxu1 %v347_v16  ;;  %v277_v36 = vadd.f32 %v276_v31, %v261_v29  ;;  %v316_v48 = vadd.f32 %v315_v43, %v301_v37  ;;  %v501_v43 = vld [vmem:[%s1234_s2] sm:$0x1] }
  0x51   : > { %685 = vmatprep.subr.mxu0 %v964_v0  ;;  %720 = vmatprep.subr.mxu1 %v964_v0 }
  0x52   : > { %686 = vmatpush3.msra.mxu0 %v346_v20  ;;  %721 = vmatpush3.msra.mxu1 %v346_v20  ;;  %v278_v41 = vadd.f32 %v277_v36, %v262_v34  ;;  %v317_v53 = vadd.f32 %v316_v48, %v302_v42  ;;  %v507_v42 = vlaneseq }
  0x53   : > { %687 = vmatprep.subr.mxu0 %v964_v0  ;;  %722 = vmatprep.subr.mxu1 %v964_v0 }
  0x54   : > { %688 = vmatpush3.msra.mxu0 %v345_v25  ;;  %723 = vmatpush3.msra.mxu1 %v345_v25  ;;  %v279_v46 = vadd.f32 %v278_v41, %v263_v39  ;;  %v318_v58 = vadd.f32 %v317_v53, %v303_v47  ;;  %v503_v47 = vld [vmem:[%s1235_s3] sm:$0x1] }
  0x55   : > { %689 = vmatprep.subr.mxu0 %v964_v0  ;;  %724 = vmatprep.subr.mxu1 %v964_v0 }
  0x56   : > { %690 = vmatpush3.msra.mxu0 %v344_v30  ;;  %725 = vmatpush3.msra.mxu1 %v344_v30  ;;  %v280_v51 = vadd.f32 %v279_v46, %v264_v44  ;;  %v319_v63 = vadd.f32 %v318_v58, %v304_v52  ;;  %v508_v44 = vshrl.u32 %v507_v42, 7 }
  0x57   : > { %691 = vmatprep.subr.mxu0 %v964_v0  ;;  %726 = vmatprep.subr.mxu1 %v964_v0 }
  0x58   : > { %692 = vmatpush3.msra.mxu0 %v343_v35  ;;  %727 = vmatpush3.msra.mxu1 %v343_v35  ;;  %v281_v56 = vadd.f32 %v280_v51, %v265_v49  ;;  %v320_v4 = vadd.f32 %v319_v63, %v305_v57  ;;  %v509_v49 = vsub.s32 0, %v508_v44 }
  0x59   : > { %693 = vmatprep.subr.mxu0 %v964_v0  ;;  %728 = vmatprep.subr.mxu1 %v964_v0 }
  0x5a   : > { %694 = vmatpush3.msra.mxu0 %v342_v40  ;;  %729 = vmatpush3.msra.mxu1 %v342_v40  ;;  %v282_v61 = vadd.f32 %v281_v56, %v266_v54  ;;  %v321_v8 = vadd.f32 %v320_v4, %v306_v62 }
  0x5b   : > { %695 = vmatprep.subr.mxu0 %v964_v0  ;;  %730 = vmatprep.subr.mxu1 %v964_v0 }
  0x5c   : > { %696 = vmatpush3.msra.mxu0 %v341_v45  ;;  %731 = vmatpush3.msra.mxu1 %v341_v45  ;;  %v283_v2 = vadd.f32 %v282_v61, %v267_v59  ;;  %v322_v11 = vadd.f32 %v321_v8, %v307_v3 }
  0x5d   : > { %697 = vmatprep.subr.mxu0 %v964_v0  ;;  %732 = vmatprep.subr.mxu1 %v964_v0 }
  0x5e   : > { %698 = vmatpush3.msra.mxu0 %v340_v50  ;;  %733 = vmatpush3.msra.mxu1 %v340_v50  ;;  %v284_v6 = vadd.f32 %v283_v2, %v268_v1  ;;  %v323_v14 = vadd.f32 %v322_v11, %v308_v7 }
  0x5f   : > { %699 = vmatprep.subr.mxu0 %v964_v0  ;;  %734 = vmatprep.subr.mxu1 %v964_v0 }
  0x60   : > { %700 = vmatpush3.msra.mxu0 %v339_v55  ;;  %735 = vmatpush3.msra.mxu1 %v339_v55  ;;  %v285_v9 = vadd.f32 %v284_v6, %v269_v5  ;;  %v324_v16 = vadd.f32 %v323_v14, %v309_v10 }
  0x61   : > { %701 = vmatprep.subr.mxu0 %v964_v0  ;;  %736 = vmatprep.subr.mxu1 %v964_v0 }
  0x62   : > { %702 = vmatpush3.msra.mxu0 %v338_v60  ;;  %737 = vmatpush3.msra.mxu1 %v338_v60  ;;  %v286_v12 = vrot.slane %v285_v9, 4  ;;  %v325_v18 = vadd.f32 %v324_v16, %v310_v13 }
  0x64   : > { %v287_v15 = vadd.f32 %v286_v12, %v285_v9  ;;  %v326_v0 = vrot.slane %v325_v18, 4 }
  0x66   : > { %v288_v17 = vrot.slane %v287_v15, 2  ;;  %v327_v21 = vadd.f32 %v326_v0, %v325_v18 }
  0x68   : > { %v289_v19 = vadd.f32 %v288_v17, %v287_v15  ;;  %v328_v24 = vrot.slane %v327_v21, 2 }
  0x6a   : > { %v290_v20 = vrot.slane %v289_v19, 1  ;;  %v329_v26 = vadd.f32 %v328_v24, %v327_v21 }
  0x6c   : > { %v291_v23 = vadd.f32 %v290_v20, %v289_v19  ;;  %v330_v27 = vrot.slane %v329_v26, 1 }
  0x6e   : > { %v292_v25 = vadd.f32 %v291_v23, %v270_v22  ;;  %v331_v29 = vadd.f32 %v330_v27, %v329_v26 }
  0x70   : > { %293 = vst [vmem:[#allocation2] sm:$0x1] %v292_v25  ;;  %v332_v30 = vadd.f32 %v331_v29, %v294_v28 }
  0x72   : > { %333 = vst [vmem:[#allocation3] sm:$0x1] %v332_v30 }
  0x77   : > { %v337_v31 = vld [vmem:[#allocation2] sm:$0x1] }
  0x78   : > { %704 = vmatmul.mubr.f32.vlgmr.msra.gmra.mxu0 %v337_v31 }
  0x79   : > { %v425_v32 = vld [vmem:[#allocation3] sm:$0x1] }
  0x7a   : > { %739 = vmatmul.mubr.f32.vlgmr.msra.gmra.mxu1 %v425_v32 }
 0x138   : > { %v420_v33 = vpop.f32.mrf.mxu0 }
 0x139   : > { %v424_v34 = vmul.f32 0.015625, %v420_v33 }
 0x13a   : > { %v705_v35 = vpop.f32.mrf.mxu0  ;;  %v492_v37 = vpop.f32.mrf.mxu1 }
 0x13b   : > { %v497_v36 = vmul.f32 %v424_v34, %v424_v34  ;;  %v496_v38 = vmul.f32 0.015625, %v492_v37 }
 0x13c   : > { %v740_v39 = vpop.f32.mrf.mxu1 }
 0x13d   : > { %v498_v40 = vsub.f32 %v496_v38, %v497_v36 }
 0x13f   : > { %v499_v41 = vadd.f32 1e-06, %v498_v40 }
 0x141   : > { %818 = vrsqrt.f32 %v499_v41 }
 0x14e   : > { %v819_v45 = vpop.eup %818 }
 0x14f   : > { %v502_v46 = vmul.f32 %v819_v45, %v501_v43 }
 0x151   : > { %v504_v48 = vmul.f32 %v502_v46, %v424_v34 }
 0x153   : > { %v505_v50 = vsub.f32 %v503_v47, %v504_v48 }
 0x155   : > { %v510_v51 = vrot.slane %v505_v50, %v509_v49 }
 0x157   : > { %v513_v52 = vsel %vm512_vm1, %v502_v46, %v510_v51 }
 0x158   : > { %514 = vst [vmem:[%s246_s10] sm:$0x3] %v513_v52 }
 0x159   : > { %887 = shalt.err (!%p884_p5)
}
 0x15a   : > { %s888_s6 = scalar_lea.hbm %s1190_s29, 32  ;;  %s892_s25 = scalar_lea.hbm %s1236_s4, 64 }
 0x15b   : > { %p889_p7 = scmp.ne.s32.totalorder %s1190_s29, %s888_s6  ;;  %p893_p9 = scmp.lt.s32.totalorder %s1190_s29, %s1236_s4 }
 0x15c   : > { %p894_p11 = scmp.lt.s32.totalorder %s892_s25, %s888_s6 }
 0x15d   : > { %p890_p4 = pnand %p889_p7, %p1082_p13 }
 0x15e   : > { %p895_p10 = por %p894_p11, %p893_p9 }
 0x15f   : > { %p891_p6 = pneg %p890_p4 }
 0x161   : > { %p896_p1 = pnand %p895_p10, %p891_p6 }
 0x163   : > { %899 = shalt.err (!%p896_p1)
}
 0x164   : > { %747 = dma.vmem_to_hbm [thread:$0]  (%p1082_p13), %s530_s24, 32, %s1190_s29, %s516_s12  }
 0x165 PF: > { %s541_s8 = sand.u32 1, %s938_s15   ;;  %p1254_p8 = scmp.ne.s32.totalorder %s1244_s26, 0 }
 0x166   : > { %p1255_p12 = scmp.ge.s32.totalorder %s958_s20, 2  ;;  %s542_s9 = scalar_lea.sflag [#allocation6], %s541_s8 }
 0x168   : > { %p758_p0 = pnand %p1255_p12, %p1254_p8 }
 0x16a   : > { %p759_p2 = pneg %p758_p0 }
 0x16c   : > { %933 = dma.done.wait (%p759_p2), %s542_s9, 32  }
 0x16d   : > { %935 = vsyncadd (%p759_p2), %s542_s9, 4294967264  ;;  %s21_s20 = sadd.s32 1, %s958_s20   ;;  %s1256_s15 = smov %s942_s16 }
 0x16e   : > { %p18_p3 = scmp.ge.s32.totalorder %s21_s20, 4   ;;  %s1257_s16 = smov %s946_s17 }
 0x16f   : > { %s1258_s17 = smov %s1091_s28  ;;  %s1259_s18 = smov %s954_s19 }
 0x170   : > { %s1260_s19 = smov %s1262_s5  ;;  %20 = sbr.rel (!%p18_p3) target bundleno = 9 (0x9), region = 93 }
 0x175   :  { %547 = vsyncpa [#allocation5], 1 }
 0x176   :  { %549 = vsyncpa [#allocation5 + $0x1], 1 }
 0x177   :  { %550 = vsyncpa [#allocation8], 1 }
 0x178   :  { %551 = vsyncpa [#allocation6], 1 }
 0x179   :  { %553 = vsyncpa [#allocation6 + $0x1], 1 }

</bundles_post_ra>
